<compile_context>
chip_gen: v7x
topology: tpu7x:2x2x1
jax: 0.10.0
libtpu: 0.0.40
codegen_flags: <defaults>
</compile_context>

<pallas_src>
import jax
import jax.numpy as jnp
from jax.experimental import pallas as pl
from jax.experimental.pallas import tpu as pltpu


DATA_DIM = 2  # torch.Size([2]) -> data_dim = 2


def _softplus(x):
    # Numerically stable softplus: max(x, 0) + log1p(exp(-|x|))
    return jnp.maximum(x, 0.0) + jnp.log1p(jnp.exp(-jnp.abs(x)))


def _round_up(x, m):
    return ((x + m - 1) // m) * m


def _make_dec_kernel(num_extra_hidden):
    """Build a kernel for `num_extra_hidden` extra ReLU(Linear(H,H)) layers."""

    def dec_kernel(*refs):
        # refs layout:
        #   z, w1, b1, [wh_i, bh_i] * num_extra_hidden, w3, b3, out
        z_ref = refs[0]
        w1_ref, b1_ref = refs[1], refs[2]
        extra = refs[3:3 + 2 * num_extra_hidden]
        w3_ref = refs[3 + 2 * num_extra_hidden]
        b3_ref = refs[4 + 2 * num_extra_hidden]
        out_ref = refs[5 + 2 * num_extra_hidden]

        # Hidden layer: Linear + ReLU (MXU matmul, f32 accumulation)
        h = jnp.dot(z_ref[...], w1_ref[...],
                    preferred_element_type=jnp.float32)            # (TB, H)
        h = jnp.maximum(h + b1_ref[...], 0.0)

        # Optional extra hidden layers (statically unrolled)
        for li in range(num_extra_hidden):
            wh = extra[2 * li][...]
            bh = extra[2 * li + 1][...]
            h = jnp.dot(h, wh, preferred_element_type=jnp.float32) + bh
            h = jnp.maximum(h, 0.0)

        # Fused heads: one (H, 2*D) matmul instead of two (H, D) matmuls
        y = jnp.dot(h, w3_ref[...],
                    preferred_element_type=jnp.float32)            # (TB, 2D)
        y = y + b3_ref[...]

        # softplus only on the sigma half (lanes >= D); mu half passes through.
        d = w3_ref.shape[1] // 2
        lane = jax.lax.broadcasted_iota(jnp.int32, y.shape, 1)
        out_ref[...] = jnp.where(lane < d, y, _softplus(y))

    return dec_kernel


def dec_forward(z, params, *, block_batch=1024):
    """z: (batch, latent_dim) f32 -> (mu, sigma), each (batch, data_dim) f32."""
    B, L = z.shape
    w1, b1 = params["w1"], params["b1"]
    extra = params.get("extra", ())          # tuple of (wh (H,H), bh (1,H))
    H = w1.shape[1]
    D = params["w31"].shape[1]
    num_extra = len(extra)

    # Fuse the two output heads into a single weight / bias.
    w3 = jnp.concatenate([params["w31"], params["w32"]], axis=1)    # (H, 2D)
    b3 = jnp.concatenate([params["b31"], params["b32"]], axis=1)    # (1, 2D)

    # Batch tile: multiple of 8; pad batch up to a multiple of the tile so
    # every block satisfies the (8,128) rule and stores stay unmasked per-row.
    tb = min(block_batch, _round_up(B, 8))
    b_pad = _round_up(B, tb)
    z_p = jnp.pad(z, ((0, b_pad - B), (0, 0))) if b_pad != B else z

    grid = (b_pad // tb,)

    const_map = lambda i: (0, 0)
    in_specs = [
        pl.BlockSpec((tb, L), lambda i: (i, 0)),     # z tile (pipelined)
        pl.BlockSpec((L, H), const_map),             # w1  (VMEM-resident)
        pl.BlockSpec((1, H), const_map),             # b1
    ]
    args = [z_p, w1, b1]
    for (wh, bh) in extra:
        in_specs += [pl.BlockSpec((H, H), const_map),
                     pl.BlockSpec((1, H), const_map)]
        args += [wh, bh]
    in_specs += [pl.BlockSpec((H, 2 * D), const_map),   # fused w3
                 pl.BlockSpec((1, 2 * D), const_map)]   # fused b3
    args += [w3, b3]

    cost = pl.CostEstimate(
        flops=2 * b_pad * (L * H + num_extra * H * H + H * 2 * D),
        transcendentals=b_pad * 2 * D,
        bytes_accessed=4 * (b_pad * L + L * H + H
                            + num_extra * (H * H + H)
                            + H * 2 * D + 2 * D + b_pad * 2 * D),
    )

    out = pl.pallas_call(
        _make_dec_kernel(num_extra),
        out_shape=jax.ShapeDtypeStruct((b_pad, 2 * D), jnp.float32),
        grid=grid,
        in_specs=in_specs,
        out_specs=pl.BlockSpec((tb, 2 * D), lambda i: (i, 0)),
        compiler_params=pltpu.CompilerParams(
            dimension_semantics=("parallel",)),
        cost_estimate=cost,
    )(*args)

    mu = out[:B, :D]
    sig = out[:B, D:]
    return mu, sig


def init_params(key, latent_dim, hidden_dim, data_dim=DATA_DIM,
                num_hidden_layers=1):
    """Deterministic synthetic parameters, PyTorch-Linear-style uniform init."""
    ks = jax.random.split(key, 6 + 2 * max(num_hidden_layers - 1, 0))

    def lin(k_w, k_b, fan_in, fan_out):
        bound = 1.0 / jnp.sqrt(jnp.asarray(fan_in, jnp.float32))
        # stored transposed: (in, out) so kernels compute x @ W
        w = jax.random.uniform(k_w, (fan_in, fan_out), jnp.float32, -bound, bound)
        b = jax.random.uniform(k_b, (1, fan_out), jnp.float32, -bound, bound)
        return w, b

    w1, b1 = lin(ks[0], ks[1], latent_dim, hidden_dim)
    w31, b31 = lin(ks[2], ks[3], hidden_dim, data_dim)
    w32, b32 = lin(ks[4], ks[5], hidden_dim, data_dim)
    extra = []
    for li in range(num_hidden_layers - 1):
        wh, bh = lin(ks[6 + 2 * li], ks[7 + 2 * li], hidden_dim, hidden_dim)
        extra.append((wh, bh))
    return {"w1": w1, "b1": b1, "w31": w31, "b31": b31, "w32": w32,
            "b32": b32, "extra": tuple(extra)}


def dec_forward_ref(z, p):
    """Pure-JAX reference for verification."""
    h = jnp.maximum(z @ p["w1"] + p["b1"], 0.0)
    for (wh, bh) in p.get("extra", ()):
        h = jnp.maximum(h @ wh + bh, 0.0)
    mu = h @ p["w31"] + p["b31"]
    sig = jax.nn.softplus(h @ p["w32"] + p["b32"])
    return mu, sig


if __name__ == "__main__":
    key = jax.random.PRNGKey(0)
    k_z, k_p, k_z2, k_p2 = jax.random.split(key, 4)

    latent_dim, hidden_dim = 4, 32
    params = init_params(k_p, latent_dim, hidden_dim, num_hidden_layers=1)

    # Primary run: batch that is already a multiple of 8.
    batch = 8
    z = jax.random.normal(k_z, (batch, latent_dim), dtype=jnp.float32)
    mu, sig = dec_forward(z, params)
    jax.block_until_ready((mu, sig))

    mu_ref, sig_ref = dec_forward_ref(z, params)
    assert mu.shape == (batch, DATA_DIM) and sig.shape == (batch, DATA_DIM)
    assert jnp.allclose(mu, mu_ref, atol=1e-5, rtol=1e-5)
    assert jnp.allclose(sig, sig_ref, atol=1e-5, rtol=1e-5)
    assert bool(jnp.all(sig > 0))

    # Second run: ragged batch to exercise the padding / remainder path.
    batch2 = 10
    z2 = jax.random.normal(k_z2, (batch2, latent_dim), dtype=jnp.float32)
    mu2, sig2 = dec_forward(z2, params)
    jax.block_until_ready((mu2, sig2))
    mu2_ref, sig2_ref = dec_forward_ref(z2, params)
    assert mu2.shape == (batch2, DATA_DIM) and sig2.shape == (batch2, DATA_DIM)
    assert jnp.allclose(mu2, mu2_ref, atol=1e-5, rtol=1e-5)
    assert jnp.allclose(sig2, sig2_ref, atol=1e-5, rtol=1e-5)

    # Third run: num_hidden_layers=2 exercises the extra-hidden-layer path.
    params2 = init_params(k_p2, latent_dim, hidden_dim, num_hidden_layers=2)
    mu3, sig3 = dec_forward(z, params2)
    jax.block_until_ready((mu3, sig3))
    mu3_ref, sig3_ref = dec_forward_ref(z, params2)
    assert jnp.allclose(mu3, mu3_ref, atol=1e-5, rtol=1e-5)
    assert jnp.allclose(sig3, sig3_ref, atol=1e-5, rtol=1e-5)

    print("KERNEL_OK")
</pallas_src>

<mosaic_0001>
module attributes {stable_mosaic.version = 11 : i64} {
  func.func @dec_kernel(%arg0: i32, %arg1: memref<8x4xf32, #tpu.memory_space<vmem>>, %arg2: memref<4x32xf32, #tpu.memory_space<vmem>>, %arg3: memref<1x32xf32, #tpu.memory_space<vmem>>, %arg4: memref<32x4xf32, #tpu.memory_space<vmem>>, %arg5: memref<1x4xf32, #tpu.memory_space<vmem>>, %arg6: memref<8x4xf32, #tpu.memory_space<vmem>>) attributes {dimension_semantics = [#tpu.dimension_semantics<parallel>], iteration_bounds = array<i64: 1>, scalar_prefetch = 0 : i64, scratch_operands = 0 : i64, tpu.core_type = #tpu.core_type<tc>, window_params = [{transform_indices = @transform_0, window_bounds = array<i64: 8, 4>}, {pipeline_mode = #tpu.pipeline_mode<synchronous>, transform_indices = @transform_1, window_bounds = array<i64: 4, 32>}, {pipeline_mode = #tpu.pipeline_mode<synchronous>, transform_indices = @transform_2, window_bounds = array<i64: 1, 32>}, {pipeline_mode = #tpu.pipeline_mode<synchronous>, transform_indices = @transform_3, window_bounds = array<i64: 32, 4>}, {pipeline_mode = #tpu.pipeline_mode<synchronous>, transform_indices = @transform_4, window_bounds = array<i64: 1, 4>}, {transform_indices = @transform_5, window_bounds = array<i64: 8, 4>}]} {
    %c0 = arith.constant 0 : index
    %c0_0 = arith.constant 0 : index
    %0 = vector.load %arg1[%c0, %c0_0] : memref<8x4xf32, #tpu.memory_space<vmem>>, vector<8x4xf32>
    %c0_1 = arith.constant 0 : index
    %c0_2 = arith.constant 0 : index
    %1 = vector.load %arg2[%c0_1, %c0_2] : memref<4x32xf32, #tpu.memory_space<vmem>>, vector<4x32xf32>
    %cst = arith.constant dense<0.000000e+00> : vector<8x32xf32>
    %2 = tpu.matmul %0, %1, %cst {dimension_numbers = #tpu.dot_dimension_numbers<[1], [0], [0], [1], [0, 0, 1, 1], [], []>} : vector<8x4xf32>, vector<4x32xf32>, vector<8x32xf32> -> vector<8x32xf32>
    %c0_3 = arith.constant 0 : index
    %c0_4 = arith.constant 0 : index
    %3 = vector.load %arg3[%c0_3, %c0_4] : memref<1x32xf32, #tpu.memory_space<vmem>>, vector<1x32xf32>
    %4 = vector.broadcast %3 : vector<1x32xf32> to vector<8x32xf32>
    %5 = arith.addf %2, %4 : vector<8x32xf32>
    %cst_5 = arith.constant 0.000000e+00 : f32
    %6 = vector.broadcast %cst_5 : f32 to vector<8x32xf32>
    %7 = arith.maximumf %5, %6 : vector<8x32xf32>
    %c0_6 = arith.constant 0 : index
    %c0_7 = arith.constant 0 : index
    %8 = vector.load %arg4[%c0_6, %c0_7] : memref<32x4xf32, #tpu.memory_space<vmem>>, vector<32x4xf32>
    %cst_8 = arith.constant dense<0.000000e+00> : vector<8x4xf32>
    %9 = tpu.matmul %7, %8, %cst_8 {dimension_numbers = #tpu.dot_dimension_numbers<[1], [0], [0], [1], [0, 0, 1, 1], [], []>} : vector<8x32xf32>, vector<32x4xf32>, vector<8x4xf32> -> vector<8x4xf32>
    %c0_9 = arith.constant 0 : index
    %c0_10 = arith.constant 0 : index
    %10 = vector.load %arg5[%c0_9, %c0_10] : memref<1x4xf32, #tpu.memory_space<vmem>>, vector<1x4xf32>
    %11 = vector.broadcast %10 : vector<1x4xf32> to vector<8x4xf32>
    %12 = arith.addf %9, %11 : vector<8x4xf32>
    %13 = tpu.iota {dimensions = array<i32: 1>} : vector<8x4xi32>
    %c2_i32 = arith.constant 2 : i32
    %14 = vector.broadcast %c2_i32 : i32 to vector<8x4xi32>
    %15 = arith.cmpi slt, %13, %14 : vector<8x4xi32>
    %cst_11 = arith.constant 0.000000e+00 : f32
    %16 = vector.broadcast %cst_11 : f32 to vector<8x4xf32>
    %17 = arith.maximumf %12, %16 : vector<8x4xf32>
    %18 = math.absf %12 : vector<8x4xf32>
    %cst_12 = arith.constant 0.000000e+00 : f32
    %19 = vector.broadcast %cst_12 : f32 to vector<8x4xf32>
    %20 = arith.subf %19, %18 : vector<8x4xf32>
    %21 = math.exp %20 : vector<8x4xf32>
    %22 = math.log1p %21 : vector<8x4xf32>
    %23 = arith.addf %17, %22 : vector<8x4xf32>
    %24 = arith.select %15, %12, %23 : vector<8x4xi1>, vector<8x4xf32>
    %c0_13 = arith.constant 0 : index
    %c0_14 = arith.constant 0 : index
    %25 = vector.load %arg6[%c0_13, %c0_14] : memref<8x4xf32, #tpu.memory_space<vmem>>, vector<8x4xf32>
    tpu.vector_store %arg6[%c0_13, %c0_14], %24 {strides = array<i32>} : memref<8x4xf32, #tpu.memory_space<vmem>>, vector<8x4xf32>,
    return
  }
  func.func @transform_0(%arg0: i32) -> (i32, i32) {
    %c0_i32 = arith.constant 0 : i32
    %c0_i32_0 = arith.constant 0 : i32
    return %arg0, %c0_i32 : i32, i32
  }
  func.func @transform_1(%arg0: i32) -> (i32, i32) {
    %c0_i32 = arith.constant 0 : i32
    %c0_i32_0 = arith.constant 0 : i32
    %c0_i32_1 = arith.constant 0 : i32
    return %c0_i32, %c0_i32_0 : i32, i32
  }
  func.func @transform_2(%arg0: i32) -> (i32, i32) {
    %c0_i32 = arith.constant 0 : i32
    %c0_i32_0 = arith.constant 0 : i32
    %c0_i32_1 = arith.constant 0 : i32
    return %c0_i32, %c0_i32_0 : i32, i32
  }
  func.func @transform_3(%arg0: i32) -> (i32, i32) {
    %c0_i32 = arith.constant 0 : i32
    %c0_i32_0 = arith.constant 0 : i32
    %c0_i32_1 = arith.constant 0 : i32
    return %c0_i32, %c0_i32_0 : i32, i32
  }
  func.func @transform_4(%arg0: i32) -> (i32, i32) {
    %c0_i32 = arith.constant 0 : i32
    %c0_i32_0 = arith.constant 0 : i32
    %c0_i32_1 = arith.constant 0 : i32
    return %c0_i32, %c0_i32_0 : i32, i32
  }
  func.func @transform_5(%arg0: i32) -> (i32, i32) {
    %c0_i32 = arith.constant 0 : i32
    %c0_i32_0 = arith.constant 0 : i32
    return %arg0, %c0_i32 : i32, i32
  }
}

</mosaic_0001>

<bundles_post_ra>
// kernel: tpu_custom_call.1
= control target key start
LH: loop header
LB: loop body
LE: loop exit
PB: predicated region body
PF: predicated region fallthrough
CT: control target
= control target key end

     0   :  { %vm33_vm0 = vcmask 1043456   ;;  %vm29_vm1 = vcmask 31744   ;;  %v258_v0 = vmov 0.0   ;;  %vm259_vm2 = vmmov 0   ;;  %s320_s1 = inlined_call_operand.vmem [shape: f32[4,32], index: 1, kind: input, shape index: {}]   ;;  %s321_s0 = inlined_call_operand.vmem [shape: f32[8,4], index: 0, kind: input, shape index: {}]   ;;  %s322_s3 = inlined_call_operand.vmem [shape: f32[32,4], index: 3, kind: input, shape index: {}]   ;;  %s323_s2 = inlined_call_operand.vmem [shape: f32[1,32], index: 2, kind: input, shape index: {}]   ;;  %s324_s4 = inlined_call_operand.vmem [shape: f32[1,4], index: 4, kind: input, shape index: {}]   ;;  %s325_s5 = inlined_call_operand.vmem [shape: f32[8,4], index: 5, kind: output, shape index: {}]  }
   0x1   :  { %229 = vmatprep.subr.mxu0 %v258_v0  ;;  %v21_v1 = vld [vmem:[%s320_s1] sm:$0xf]  ;;  %231 = vmatprep.mubr.msk.f32.mxu0 %vm259_vm2, %v258_v0  ;;  %v260_v4 = vmov 0.0|0.0   ;;  %v109_v5 = vld [vmem:[%s322_s3 + $0x8] sm:$0xff]  ;;  %v110_v7 = vld [vmem:[%s322_s3 + $0x10] sm:$0xff]  ;;  %vm119_vm3 = vcmask 261120   ;;  %v193_v25 = vlaneseq }
   0x2   :  { %v20_v2 = vld [vmem:[%s321_s0] sm:$0xff]  ;;  %230 = vmatpush3.msk.msra.mxu0 %vm33_vm0, %v21_v1  ;;  %245 = vmatprep.subr.bf16.mxu1 %v260_v4  ;;  %v111_v8 = vld [vmem:[%s322_s3 + $0x18] sm:$0xff] }
   0x3   :  { %v108_v3 = vld [vmem:[%s322_s3] sm:$0xff]  ;;  %232 = vmatmul.mubr.msk.f32.vlgmr.msra.gmra.mrb[0].mxu0 %vm29_vm1, %v20_v2  ;;  %242 = vmatprep.mubr.msk.f32.mxu1 %vm259_vm2, %v258_v0  ;;  %v249_v9 = vpack.c.bf16 %v111_v8, %v110_v7  ;;  %v194_v28 = vand.u32 127, %v193_v25 }
   0x4   :  { %v246_v6 = vpack.c.bf16 %v109_v5, %v108_v3  ;;  %v217_v10 = vld [vmem:[%s323_s2] ss:$0 sm:$0xff] }
   0x5   :  { %v220_v15 = vld [vmem:[%s324_s4] ss:$0 sm:$0xff]  ;;  %vm195_vm5 = vcmp.lt.s32.totalorder %v194_v28, 2 }
   0x6   :  { %247 = vmatpush3.bf16.msra.mxu1 %v246_v6 }
   0x7   :  { %248 = vmatprep.subr.bf16.mxu1 %v260_v4 }
   0xa   :  { %250 = vmatpush3.bf16.msra.mxu1 %v249_v9 }
  0xd6   :  { %v103_v11 = vpop.f32.mrb[0].mxu0 }
  0xd7   :  { %v104_v12 = vadd.f32 %v217_v10, %v103_v11  ;;  %v233_v13 = vpop.f32.mrb[1].mxu0 }
  0xd9   :  { %v107_v14 = vmax.f32 %v104_v12, 0.0 }
  0xdb   :  { %243 = vmatmul.mubr.msk.f32.vlgmr.msra.gmra.mrb[0].mxu1 %vm119_vm3, %v107_v14 }
 0x1ae   :  { %v189_v16 = vpop.f32.mrb[0].mxu1 }
 0x1af   :  { %v190_v17 = vadd.f32 %v220_v15, %v189_v16  ;;  %v244_v18 = vpop.f32.mrb[1].mxu1 }
 0x1b1   :  { %v197_v19 = vand.u32 2147483647, %v190_v17  ;;  %v196_v32 = vmax.f32 %v190_v17, 0.0 }
 0x1b3   :  { %v198_v20 = vsub.f32 0.0, %v197_v19 }
 0x1b5   :  { %v199_v21 = vmul.f32 1.442695, %v198_v20 }
 0x1b7   :  { %254 = vpow2.f32 %v199_v21 }
 0x1c1   :  { %v255_v22 = vpop.eup %254 }
 0x1c2   :  { %v201_v23 = vadd.f32 1.0, %v255_v22  ;;  %v204_v24 = vmul.f32 -0.5, %v255_v22  ;;  %v207_v27 = vand.u32 2147483647, %v255_v22 }
 0x1c4   :  { %256 = vlog2.f32 %v201_v23  ;;  %v205_v26 = vadd.f32 1.0, %v204_v24  ;;  %vm208_vm4 = vcmp.lt.f32.partialorder %v207_v27, 0.0004427343 }
 0x1c6   :  { %v206_v31 = vmul.f32 %v255_v22, %v205_v26 }
 0x1ce   :  { %v257_v29 = vpop.eup %256 }
 0x1cf   :  { %v203_v30 = vmul.f32 0.6931472, %v257_v29 }
 0x1d1   :  { %v209_v33 = vsel %vm208_vm4, %v206_v31, %v203_v30 }
 0x1d2   :  { %v210_v34 = vadd.f32 %v209_v33, %v196_v32 }
 0x1d4   :  { %v211_v35 = vsel %vm195_vm5, %v190_v17, %v210_v34 }
 0x1d5   :  { %212 = vst.msk [vmem:[%s325_s5] sm:$0xff] %vm29_vm1, %v211_v35 }

</bundles_post_ra>
